<compile_context>
chip_gen: v7x
topology: tpu7x:2x2x1
jax: 0.10.0
libtpu: 0.0.40
codegen_flags: <defaults>
</compile_context>

<pallas_src>
import jax
import jax.numpy as jnp
import numpy as np
from jax.experimental import pallas as pl
from jax.experimental.pallas import tpu as pltpu


# --------------------- Path A: zero-traffic aliased identity ---------------------

def _alias_touch_kernel(x_hbm, o_hbm):
    # Output aliases the input buffer; mark it as read+written so the aliased
    # output materializes.  No data is moved.
    pltpu.touch(o_hbm)


def _identity_alias(x):
    return pl.pallas_call(
        _alias_touch_kernel,
        out_shape=jax.ShapeDtypeStruct(x.shape, x.dtype),
        in_specs=[pl.BlockSpec(memory_space=pl.ANY)],
        out_specs=pl.BlockSpec(memory_space=pl.ANY),
        input_output_aliases={0: 0},
    )(x)


# --------------------- Path B: single HBM->HBM DMA (fallback) --------------------

def _dma_copy_kernel(x_hbm, o_hbm, sem):
    cp = pltpu.make_async_copy(x_hbm, o_hbm, sem)
    cp.start()
    cp.wait()


def _identity_dma(x):
    nbytes = x.size * jnp.dtype(x.dtype).itemsize
    return pl.pallas_call(
        _dma_copy_kernel,
        out_shape=jax.ShapeDtypeStruct(x.shape, x.dtype),
        in_specs=[pl.BlockSpec(memory_space=pl.ANY)],
        out_specs=pl.BlockSpec(memory_space=pl.ANY),
        scratch_shapes=[pltpu.SemaphoreType.DMA(())],
        cost_estimate=pl.CostEstimate(
            flops=0, transcendentals=0, bytes_accessed=2 * nbytes),
    )(x)


# ------------------------------- Implementation pick -----------------------------

_IDENTITY_IMPL = None


def _select_impl():
    """Pick the zero-copy aliased kernel if it compiles+runs; else the DMA copy."""
    global _IDENTITY_IMPL
    if _IDENTITY_IMPL is None:
        try:
            probe = jnp.asarray(np.zeros((8, 128), np.float32))
            jax.block_until_ready(_identity_alias(probe))
            _IDENTITY_IMPL = _identity_alias
        except Exception:
            _IDENTITY_IMPL = _identity_dma
    return _IDENTITY_IMPL


def my_model_forward(x):
    """Forward pass of MyModel: identity (both Block.forward calls return their input)."""
    return _select_impl()(x)


if __name__ == "__main__":
    key = jax.random.PRNGKey(0)

    # Small NCHW input consistent with MyModel(in_features=4, out_features=...).
    x = jax.random.normal(key, (2, 4, 16, 16), jnp.float32)

    y = my_model_forward(x)
    y = jax.block_until_ready(y)

    # Forward is identity: verify exact match.
    assert y.shape == x.shape and y.dtype == x.dtype
    assert bool(jnp.all(y == x))

    print("KERNEL_OK")
</pallas_src>

<mosaic_0001>
module attributes {stable_mosaic.version = 11 : i64} {
  func.func @_alias_touch_kernel(%arg0: memref<8x128xf32, #tpu.memory_space<any>>, %arg1: memref<8x128xf32, #tpu.memory_space<any>>) attributes {dimension_semantics = [], scalar_prefetch = 0 : i64, scratch_operands = 0 : i64, tpu.core_type = #tpu.core_type<tc>} {
    return
  }
}

module attributes {stable_mosaic.version = 11 : i64} {
  func.func @_dma_copy_kernel(%arg0: memref<2x4x16x16xf32, #tpu.memory_space<any>>, %arg1: memref<2x4x16x16xf32, #tpu.memory_space<any>>, %arg2: memref<!tpu.dma_semaphore, #tpu.memory_space<semaphore_mem>>) attributes {dimension_semantics = [], scalar_prefetch = 0 : i64, scratch_operands = 1 : i64, tpu.core_type = #tpu.core_type<tc>} {
    tpu.enqueue_dma source(%arg0 : memref<2x4x16x16xf32, #tpu.memory_space<any>>) target(%arg1 : memref<2x4x16x16xf32, #tpu.memory_space<any>>) target_semaphore(%arg2 : memref<!tpu.dma_semaphore, #tpu.memory_space<semaphore_mem>>)
    tpu.wait_dma2 semaphore(%arg2 : memref<!tpu.dma_semaphore, #tpu.memory_space<semaphore_mem>>) src(%arg0 : memref<2x4x16x16xf32, #tpu.memory_space<any>>) dst(%arg1 : memref<2x4x16x16xf32, #tpu.memory_space<any>>)
    return
  }
}

</mosaic_0001>

<bundles_post_ra>
// kernel: tpu_custom_call.1
= control target key start
LH: loop header
LB: loop body
LE: loop exit
PB: predicated region body
PF: predicated region fallthrough
CT: control target
= control target key end

     0   :  { %s16_s0 = inlined_call_operand.hbm [shape: f32[8,128], index: 0, kind: input, shape index: {}, may-alias: {0,1}]   ;;  %s17_s1 = inlined_call_operand.hbm [shape: f32[8,128], index: 1, kind: output, shape index: {}, may-alias: {0,1}]  }

// kernel: tpu_custom_call.1
= control target key start
LH: loop header
LB: loop body
LE: loop exit
PB: predicated region body
PF: predicated region fallthrough
CT: control target
= control target key end

     0   :  { %s36_s6 = smov [#allocation2]   ;;  %s37_s7 = smov [#allocation3]   ;;  %s55_s0 = inlined_call_operand.hbm [shape: f32[2,4,16,16], index: 0, kind: input, shape index: {}]   ;;  %s56_s1 = inlined_call_operand.hbm [shape: f32[2,4,16,16], index: 1, kind: output, shape index: {}]  }
   0x1   :  { %s38_s8 = smov 0  }
   0x2   :  { %18 = dma.general %s55_s0, 2048, %s56_s1, %s36_s6, %s37_s7, [#allocation4], %s38_s8, 0  }
   0x3   :  { %34 = dma.done.wait [#allocation2], 2048 }
   0x4   :  { %35 = vsyncadd [#allocation2], 4294965248 }
   0x5   :  { %24 = vsyncmov [#allocation2] }
   0x8   :  { %s25_s13 = vpop.sfrf %24 }
   0x9   :  { %p30_p0 = scmp.ne.s32.totalorder %s25_s13, 0 }
   0xb   :  { %29 = shalt.err (%p30_p0)  }

</bundles_post_ra>
